<compile_context>
chip_gen: v7x
topology: tpu7x:2x2x1
jax: 0.10.0
libtpu: 0.0.40
codegen_flags: <defaults>
</compile_context>

<pallas_src>
import jax
import jax.numpy as jnp
from jax.experimental import pallas as pl
from jax.experimental.pallas import tpu as pltpu


def _round_up(x, m):
    return ((x + m - 1) // m) * m


def _make_kernel(n_features):
    """Kernel over lane-dense (rows, LANES) feature tiles."""

    def kernel(w_ref, b_ref, *refs):
        # w_ref: SMEM (D,)   b_ref: SMEM (1,)
        # refs : n_features input tiles (rows, LANES) in VMEM, then o_ref.
        feat_refs = refs[:n_features]
        o_ref = refs[n_features]

        # VPU multiply-accumulate with scalar weights read from SMEM.
        acc = feat_refs[0][...].astype(jnp.float32) * w_ref[0]
        for f in range(1, n_features):
            acc = acc + feat_refs[f][...].astype(jnp.float32) * w_ref[f]

        o_ref[...] = acc + b_ref[0]

    return kernel


def linear_forward(xs, weight, bias):
    """Fused `torch.cat(xs, 1)` + `nn.Linear(D, 1)` forward.

    xs: sequence of (B, k_i) arrays; weight: (1, D) (PyTorch layout);
    bias: (1,).  Returns (B, 1) float32.
    """
    xs = [jnp.asarray(c, dtype=jnp.float32) for c in xs]
    B = int(xs[0].shape[0])
    widths = [int(c.shape[1]) for c in xs]
    D = sum(widths)
    assert tuple(weight.shape) == (1, D), weight.shape

    # Split every column into width-1 feature vectors (a free reshape for the
    # width-1 columns of the flink test; a cheap slice otherwise).
    feats = []
    for c in xs:
        for j in range(c.shape[1]):
            feats.append(c[:, j])

    # Lane-dense view: (B,) -> (R, LANES), LANES a multiple of 128.
    lanes = next((l for l in (512, 256, 128) if B % l == 0), None)
    if lanes is None:
        # TODO(synk): handle the ragged tail in-kernel instead of padding.
        lanes = 128
        B_pad = _round_up(B, lanes)
        feats = [jnp.pad(f, (0, B_pad - B)) for f in feats]
    else:
        B_pad = B
    R = B_pad // lanes
    feats = [f.reshape(R, lanes) for f in feats]

    # Row-block sizing: ~2 MiB useful data per grid step, double-buffered
    # footprint of all D inputs + output kept under ~16 MiB.
    bytes_per_row = (D + 1) * lanes * 4
    target_rows = _round_up(max(1, (2 * 1024 * 1024) // bytes_per_row), 8)
    vmem_cap_rows = max(8, ((16 * 1024 * 1024) // (2 * bytes_per_row)) // 8 * 8)
    tbr = min(target_rows, vmem_cap_rows)
    if tbr >= R:
        tbr = R  # single grid step; block == full array extent (always legal)
    grid = (pl.cdiv(R, tbr),)

    w = jnp.asarray(weight, jnp.float32).reshape(D)   # 1-D SMEM weight
    b = jnp.asarray(bias, jnp.float32).reshape(1)     # SMEM bias

    feat_specs = [pl.BlockSpec((tbr, lanes), lambda i: (i, 0)) for _ in feats]

    out = pl.pallas_call(
        _make_kernel(D),
        out_shape=jax.ShapeDtypeStruct((R, lanes), jnp.float32),
        grid=grid,
        in_specs=[
            pl.BlockSpec(memory_space=pltpu.MemorySpace.SMEM),   # weight (D,)
            pl.BlockSpec(memory_space=pltpu.MemorySpace.SMEM),   # bias   (1,)
            *feat_specs,
        ],
        out_specs=pl.BlockSpec((tbr, lanes), lambda i: (i, 0)),
        compiler_params=pltpu.CompilerParams(
            dimension_semantics=("parallel",),
            vmem_limit_bytes=32 * 1024 * 1024,
        ),
        cost_estimate=pl.CostEstimate(
            flops=2 * B_pad * D,
            transcendentals=0,
            bytes_accessed=(D + 1) * B_pad * 4,
        ),
    )(w, b, *feats)

    # Free, contiguous reshape back to (B, 1).
    return out.reshape(-1)[:B].reshape(B, 1)


if __name__ == "__main__":
    key = jax.random.PRNGKey(0)
    k_x, k_w, k_b, k_x2 = jax.random.split(key, 4)

    # Mirrors the flink test: 4 width-1 feature columns, nn.Linear(4, 1).
    batch, col_num = 2048, 4
    xs = [
        jax.random.normal(jax.random.fold_in(k_x, i), (batch, 1),
                          dtype=jnp.float32)
        for i in range(col_num)
    ]
    bound = 1.0 / (col_num ** 0.5)
    weight = jax.random.uniform(k_w, (1, col_num), minval=-bound, maxval=bound,
                                dtype=jnp.float32)
    bias = jax.random.uniform(k_b, (1,), minval=-bound, maxval=bound,
                              dtype=jnp.float32)

    out = jax.block_until_ready(linear_forward(xs, weight, bias))
    ref = jnp.concatenate(xs, axis=1) @ weight.T + bias
    assert out.shape == (batch, 1)
    assert jnp.allclose(out, ref, atol=1e-5, rtol=1e-5), "mismatch vs reference"

    # Second config: ragged batch (not a multiple of 128) + mixed column widths.
    batch2 = 300
    xs2 = [
        jax.random.normal(jax.random.fold_in(k_x2, 0), (batch2, 2),
                          dtype=jnp.float32),
        jax.random.normal(jax.random.fold_in(k_x2, 1), (batch2, 1),
                          dtype=jnp.float32),
        jax.random.normal(jax.random.fold_in(k_x2, 2), (batch2, 1),
                          dtype=jnp.float32),
    ]
    out2 = jax.block_until_ready(linear_forward(xs2, weight, bias))
    ref2 = jnp.concatenate(xs2, axis=1) @ weight.T + bias
    assert out2.shape == (batch2, 1)
    assert jnp.allclose(out2, ref2, atol=1e-5, rtol=1e-5), "mismatch (ragged/mixed)"

    print("KERNEL_OK")
</pallas_src>

<mosaic_0001>
module attributes {stable_mosaic.version = 11 : i64} {
  func.func @kernel(%arg0: i32, %arg1: memref<4xf32, #tpu.memory_space<smem>>, %arg2: memref<1xf32, #tpu.memory_space<smem>>, %arg3: memref<4x512xf32, #tpu.memory_space<vmem>>, %arg4: memref<4x512xf32, #tpu.memory_space<vmem>>, %arg5: memref<4x512xf32, #tpu.memory_space<vmem>>, %arg6: memref<4x512xf32, #tpu.memory_space<vmem>>, %arg7: memref<4x512xf32, #tpu.memory_space<vmem>>) attributes {dimension_semantics = [#tpu.dimension_semantics<parallel>], iteration_bounds = array<i64: 1>, scalar_prefetch = 0 : i64, scratch_operands = 0 : i64, tpu.core_type = #tpu.core_type<tc>, window_params = [{transform_indices = @transform_0, window_bounds = array<i64: 4>}, {transform_indices = @transform_1, window_bounds = array<i64: 1>}, {transform_indices = @transform_2, window_bounds = array<i64: 4, 512>}, {transform_indices = @transform_3, window_bounds = array<i64: 4, 512>}, {transform_indices = @transform_4, window_bounds = array<i64: 4, 512>}, {transform_indices = @transform_5, window_bounds = array<i64: 4, 512>}, {transform_indices = @transform_6, window_bounds = array<i64: 4, 512>}]} {
    %c0 = arith.constant 0 : index
    %c0_0 = arith.constant 0 : index
    %0 = vector.load %arg3[%c0, %c0_0] : memref<4x512xf32, #tpu.memory_space<vmem>>, vector<4x512xf32>
    %c0_1 = arith.constant 0 : index
    %1 = memref.load %arg1[%c0_1] : memref<4xf32, #tpu.memory_space<smem>>
    %2 = vector.broadcast %1 : f32 to vector<4x512xf32>
    %3 = arith.mulf %0, %2 : vector<4x512xf32>
    %c0_2 = arith.constant 0 : index
    %c0_3 = arith.constant 0 : index
    %4 = vector.load %arg4[%c0_2, %c0_3] : memref<4x512xf32, #tpu.memory_space<vmem>>, vector<4x512xf32>
    %c1 = arith.constant 1 : index
    %5 = memref.load %arg1[%c1] : memref<4xf32, #tpu.memory_space<smem>>
    %6 = vector.broadcast %5 : f32 to vector<4x512xf32>
    %7 = arith.mulf %4, %6 : vector<4x512xf32>
    %8 = arith.addf %3, %7 : vector<4x512xf32>
    %c0_4 = arith.constant 0 : index
    %c0_5 = arith.constant 0 : index
    %9 = vector.load %arg5[%c0_4, %c0_5] : memref<4x512xf32, #tpu.memory_space<vmem>>, vector<4x512xf32>
    %c2 = arith.constant 2 : index
    %10 = memref.load %arg1[%c2] : memref<4xf32, #tpu.memory_space<smem>>
    %11 = vector.broadcast %10 : f32 to vector<4x512xf32>
    %12 = arith.mulf %9, %11 : vector<4x512xf32>
    %13 = arith.addf %8, %12 : vector<4x512xf32>
    %c0_6 = arith.constant 0 : index
    %c0_7 = arith.constant 0 : index
    %14 = vector.load %arg6[%c0_6, %c0_7] : memref<4x512xf32, #tpu.memory_space<vmem>>, vector<4x512xf32>
    %c3 = arith.constant 3 : index
    %15 = memref.load %arg1[%c3] : memref<4xf32, #tpu.memory_space<smem>>
    %16 = vector.broadcast %15 : f32 to vector<4x512xf32>
    %17 = arith.mulf %14, %16 : vector<4x512xf32>
    %18 = arith.addf %13, %17 : vector<4x512xf32>
    %c0_8 = arith.constant 0 : index
    %19 = memref.load %arg2[%c0_8] : memref<1xf32, #tpu.memory_space<smem>>
    %20 = vector.broadcast %19 : f32 to vector<4x512xf32>
    %21 = arith.addf %18, %20 : vector<4x512xf32>
    %c0_9 = arith.constant 0 : index
    %c0_10 = arith.constant 0 : index
    %22 = vector.load %arg7[%c0_9, %c0_10] : memref<4x512xf32, #tpu.memory_space<vmem>>, vector<4x512xf32>
    tpu.vector_store %arg7[%c0_9, %c0_10], %21 {strides = array<i32>} : memref<4x512xf32, #tpu.memory_space<vmem>>, vector<4x512xf32>,
    return
  }
  func.func @transform_0(%arg0: i32) -> i32 {
    %c0_i32 = arith.constant 0 : i32
    %c0_i32_0 = arith.constant 0 : i32
    return %c0_i32 : i32
  }
  func.func @transform_1(%arg0: i32) -> i32 {
    %c0_i32 = arith.constant 0 : i32
    %c0_i32_0 = arith.constant 0 : i32
    return %c0_i32 : i32
  }
  func.func @transform_2(%arg0: i32) -> (i32, i32) {
    %c0_i32 = arith.constant 0 : i32
    %c0_i32_0 = arith.constant 0 : i32
    return %arg0, %c0_i32 : i32, i32
  }
  func.func @transform_3(%arg0: i32) -> (i32, i32) {
    %c0_i32 = arith.constant 0 : i32
    %c0_i32_0 = arith.constant 0 : i32
    return %arg0, %c0_i32 : i32, i32
  }
  func.func @transform_4(%arg0: i32) -> (i32, i32) {
    %c0_i32 = arith.constant 0 : i32
    %c0_i32_0 = arith.constant 0 : i32
    return %arg0, %c0_i32 : i32, i32
  }
  func.func @transform_5(%arg0: i32) -> (i32, i32) {
    %c0_i32 = arith.constant 0 : i32
    %c0_i32_0 = arith.constant 0 : i32
    return %arg0, %c0_i32 : i32, i32
  }
  func.func @transform_6(%arg0: i32) -> (i32, i32) {
    %c0_i32 = arith.constant 0 : i32
    %c0_i32_0 = arith.constant 0 : i32
    return %arg0, %c0_i32 : i32, i32
  }
}

</mosaic_0001>

<bundles_post_ra>
// kernel: tpu_custom_call.1
= control target key start
LH: loop header
LB: loop body
LE: loop exit
PB: predicated region body
PF: predicated region fallthrough
CT: control target
= control target key end

     0   :  { %12 = vsyncpa [#allocation6], 0  ;;  %s342_s0 = inlined_call_operand.vmem [shape: f32[4], index: 0, kind: input, shape index: {}]   ;;  %s343_s1 = inlined_call_operand.<no memory space> [shape: f32[1], index: 1, kind: input, shape index: {}]   ;;  %s344_s2 = inlined_call_operand.hbm [shape: f32[4,512], index: 2, kind: input, shape index: {}]   ;;  %s345_s3 = inlined_call_operand.hbm [shape: f32[4,512], index: 3, kind: input, shape index: {}]   ;;  %s346_s4 = inlined_call_operand.hbm [shape: f32[4,512], index: 4, kind: input, shape index: {}]   ;;  %s347_s5 = inlined_call_operand.vmem [shape: f32[4,512], index: 5, kind: input, shape index: {}]   ;;  %s348_s6 = inlined_call_operand.hbm [shape: f32[4,512], index: 6, kind: output, shape index: {}]  }
   0x1   :  { %13 = vsyncpa [#allocation4], 0 }
   0x2   :  { %14 = vsyncpa [#allocation9], 0 }
   0x3   :  { %15 = vsyncpa [#allocation5], 0  ;;  %s22_s23 = sshll.u32 %s342_s0, 4  ;;  %s242_s24 = smov [#allocation8]   ;;  %s23_s23 = int_to_ptr.vmem [resolvable:$true] %s22_s23 }
   0x4   :  { %s44_s25 = sshll.u32 %s242_s24, 4  ;;  %s134_s28 = scalar_lea.hbm %s345_s3, 256  ;;  %s45_s25 = int_to_ptr.vmem [resolvable:$true] %s44_s25 }
   0x5   :  { %p135_p0 = scmp.ne.s32.totalorder %s345_s3, %s134_s28  ;;  %p138_p1 = scmp.lt.u32.totalorder %s134_s28, %s345_s3 }
   0x7   :  { %p140_p2 = pnand %p138_p1, %p135_p0 }
   0x9   :  { %143 = shalt.err (!%p140_p2)
}
   0xa   :  { %s144_s9 = scalar_lea.vmem %s45_s25, 256  ;;  %p149_p4 = scmp.lt.s32.totalorder %s45_s25, %s45_s25 }
   0xb   :  { %p145_p3 = scmp.ne.s32.totalorder %s45_s25, %s144_s9  ;;  %p150_p5 = scmp.lt.s32.totalorder %s144_s9, %s144_s9 }
   0xd   :  { %p151_p6 = por %p150_p5, %p149_p4 }
   0xf   :  { %p152_p7 = pnand %p151_p6, %p145_p3 }
  0x11   :  { %155 = shalt.err (!%p152_p7)
}
  0x12   :  { %47 = dma.hbm_to_vmem [thread:$0]  %s345_s3, 256, %s45_s25, [#allocation9]  }
  0x13   :  { %s156_s11 = scalar_lea.vmem %s23_s23, 16  ;;  %p161_p9 = scmp.lt.s32.totalorder %s23_s23, %s23_s23 }
  0x14   :  { %p157_p8 = scmp.ne.s32.totalorder %s23_s23, %s156_s11  ;;  %p162_p10 = scmp.lt.s32.totalorder %s156_s11, %s156_s11 }
  0x16   :  { %p163_p11 = por %p162_p10, %p161_p9 }
  0x18   :  { %p164_p12 = pnand %p163_p11, %p157_p8 }
  0x1a   :  { %167 = shalt.err (!%p164_p12)
}
  0x1b   :  { %s243_s12 = smov [#allocation3]   ;;  %s244_s13 = smov [#allocation7]  }
  0x1c   :  { %25 = dma.vmem_to_smem %s23_s23, 16, %s243_s12, [#allocation6]  }
  0x1d   :  { %s34_s14 = sshll.u32 %s244_s13, 4  ;;  %s245_s15 = smov [#allocation10]   ;;  %s35_s14 = int_to_ptr.vmem [resolvable:$true] %s34_s14 }
  0x1e   :  { %s54_s16 = sshll.u32 %s245_s15, 4  ;;  %s168_s19 = scalar_lea.hbm %s344_s2, 256  ;;  %s55_s16 = int_to_ptr.vmem [resolvable:$true] %s54_s16 }
  0x1f   :  { %p169_p13 = scmp.ne.s32.totalorder %s344_s2, %s168_s19  ;;  %p172_p0 = scmp.lt.u32.totalorder %s168_s19, %s344_s2 }
  0x21   :  { %p174_p1 = pnand %p172_p0, %p169_p13 }
  0x23   :  { %177 = shalt.err (!%p174_p1)
}
  0x24   :  { %s178_s23 = scalar_lea.vmem %s35_s14, 256  ;;  %p183_p3 = scmp.lt.s32.totalorder %s35_s14, %s35_s14 }
  0x25   :  { %p179_p2 = scmp.ne.s32.totalorder %s35_s14, %s178_s23  ;;  %p184_p4 = scmp.lt.s32.totalorder %s178_s23, %s178_s23 }
  0x27   :  { %p185_p5 = por %p184_p4, %p183_p3 }
  0x29   :  { %p186_p6 = pnand %p185_p5, %p179_p2 }
  0x2b   :  { %189 = shalt.err (!%p186_p6)
}
  0x2c   :  { %37 = dma.hbm_to_vmem [thread:$0]  %s344_s2, 256, %s35_s14, [#allocation4]  }
  0x2d   :  { %s190_s28 = scalar_lea.hbm %s346_s4, 256 }
  0x2e   :  { %p191_p7 = scmp.ne.s32.totalorder %s346_s4, %s190_s28  ;;  %p194_p8 = scmp.lt.u32.totalorder %s190_s28, %s346_s4 }
  0x30   :  { %p196_p9 = pnand %p194_p8, %p191_p7 }
  0x32   :  { %199 = shalt.err (!%p196_p9)
}
  0x33   :  { %s200_s9 = scalar_lea.vmem %s55_s16, 256  ;;  %p205_p11 = scmp.lt.s32.totalorder %s55_s16, %s55_s16 }
  0x34   :  { %p201_p10 = scmp.ne.s32.totalorder %s55_s16, %s200_s9  ;;  %p206_p12 = scmp.lt.s32.totalorder %s200_s9, %s200_s9 }
  0x36   :  { %p207_p13 = por %p206_p12, %p205_p11 }
  0x38   :  { %p208_p0 = pnand %p207_p13, %p201_p10 }
  0x3a   :  { %211 = shalt.err (!%p208_p0)
}
  0x3b   :  { %57 = dma.hbm_to_vmem [thread:$0]  %s346_s4, 256, %s55_s16, [#allocation9]  }
  0x3c   :  { %234 = dma.done.wait [#allocation6], 16  }
  0x3d   :  { %235 = vsyncadd [#allocation6], 4294967280 }
  0x3e   :  { %236 = dma.done.wait [#allocation4], 256  }
  0x3f   :  { %237 = vsyncadd [#allocation4], 4294967040 }
  0x40   :  { %238 = dma.done.wait [#allocation9], 512  }
  0x41   :  { %239 = vsyncadd [#allocation9], 4294966784 }
  0x42   :  { %72 = sfence }
  0x43   :  { %s75_s10 = sld [smem:[#allocation3]]  ;;  %s126_s11 = sld [smem:[#allocation3 + $0x1]]  ;;  %v73_v0 = vld [vmem:[#allocation7] sm:$0xff]  ;;  %v79_v1 = vld [vmem:[#allocation8] sm:$0xff]  ;;  %v74_v3 = vld [vmem:[#allocation7 + $0x8] sm:$0xff]  ;;  %v104_v23 = vstv %s343_s1 }
  0x44   :  { %s127_s12 = sld [smem:[#allocation3 + $0x2]]  ;;  %s128_s13 = sld [smem:[#allocation3 + $0x3]]  ;;  %v87_v2 = vld [vmem:[#allocation10] sm:$0xff]  ;;  %v80_v4 = vld [vmem:[#allocation8 + $0x8] sm:$0xff]  ;;  %v88_v8 = vld [vmem:[#allocation10 + $0x8] sm:$0xff] }
  0x45   :  { %v95_v7 = vld [vmem:[%s347_s5] sm:$0xff]  ;;  %v96_v13 = vld [vmem:[%s347_s5 + $0x8] sm:$0xff]  ;;  %s246_s19 = smov [#allocation11]  }
  0x46   :  { %s115_s3 = sshll.u32 %s246_s19, 4  ;;  %s116_s3 = int_to_ptr.vmem [resolvable:$true] %s115_s3 }
  0x47   :  { %s212_s5 = scalar_lea.vmem %s116_s3, 256  ;;  %p217_p2 = scmp.lt.s32.totalorder %s116_s3, %s116_s3 }
  0x48   :  { %p213_p1 = scmp.ne.s32.totalorder %s116_s3, %s212_s5  ;;  %p218_p3 = scmp.lt.s32.totalorder %s212_s5, %s212_s5 }
  0x49   :  { %v76_v5 = vstv %s75_s10  ;;  %v82_v6 = vstv %s126_s11 }
  0x4a   :  { %v77_v9 = vmul.f32 %v76_v5, %v73_v0  ;;  %v83_v10 = vmul.f32 %v82_v6, %v79_v1  ;;  %v90_v11 = vstv %s127_s12  ;;  %v98_v12 = vstv %s128_s13  ;;  %p219_p4 = por %p218_p3, %p217_p2 }
  0x4b   :  { %v91_v14 = vmul.f32 %v90_v11, %v87_v2  ;;  %v78_v15 = vmul.f32 %v76_v5, %v74_v3  ;;  %v84_v16 = vmul.f32 %v82_v6, %v80_v4  ;;  %v99_v18 = vmul.f32 %v98_v12, %v95_v7 }
  0x4c   :  { %v85_v17 = vadd.f32 %v83_v10, %v77_v9  ;;  %v92_v19 = vmul.f32 %v90_v11, %v88_v8  ;;  %v100_v21 = vmul.f32 %v98_v12, %v96_v13  ;;  %p220_p5 = pnand %p219_p4, %p213_p1 }
  0x4d   :  { %v86_v20 = vadd.f32 %v84_v16, %v78_v15 }
  0x4e   :  { %v93_v22 = vadd.f32 %v91_v14, %v85_v17 }
  0x4f   :  { %v94_v24 = vadd.f32 %v92_v19, %v86_v20 }
  0x50   :  { %v101_v25 = vadd.f32 %v99_v18, %v93_v22 }
  0x51   :  { %v102_v26 = vadd.f32 %v100_v21, %v94_v24 }
  0x52   :  { %v105_v27 = vadd.f32 %v104_v23, %v101_v25 }
  0x53   :  { %v106_v28 = vadd.f32 %v104_v23, %v102_v26 }
  0x54   :  { %107 = vst [vmem:[#allocation11] sm:$0xff] %v105_v27 }
  0x55   :  { %108 = vst [vmem:[#allocation11 + $0x8] sm:$0xff] %v106_v28 }
  0x56   :  { %223 = shalt.err (!%p220_p5)
}
  0x57   :  { %s224_s1 = scalar_lea.hbm %s348_s6, 256 }
  0x58   :  { %p225_p6 = scmp.ne.s32.totalorder %s348_s6, %s224_s1  ;;  %p228_p7 = scmp.lt.u32.totalorder %s224_s1, %s348_s6 }
  0x5a   :  { %p230_p8 = pnand %p228_p7, %p225_p6 }
  0x5c   :  { %233 = shalt.err (!%p230_p8)
}
  0x5d   :  { %118 = dma.vmem_to_hbm [thread:$0]  %s116_s3, 256, %s348_s6, [#allocation5]  }
  0x5e   :  { %240 = dma.done.wait [#allocation5], 256  }
  0x5f   :  { %241 = vsyncadd [#allocation5], 4294967040 }
  0x60   :  { %122 = vsyncpa [#allocation4], 1 }
  0x61   :  { %123 = vsyncpa [#allocation9], 1 }
  0x62   :  { %124 = vsyncpa [#allocation5], 1 }
  0x63   :  { %125 = vsyncpa [#allocation6], 1 }

</bundles_post_ra>
